<compile_context>
chip_gen: v6e
topology: v6e:2x2x1
jax: 0.10.0
libtpu: 0.0.40
codegen_flags: <defaults>
</compile_context>

<pallas_src>
import functools

import jax
import jax.numpy as jnp
from jax.experimental import pallas as pl
from jax.experimental.pallas import tpu as pltpu


def _round_up(n, m):
    return ((n + m - 1) // m) * m


@functools.lru_cache(maxsize=1)
def _tpu_hw():
    """Best-effort hardware query: (vmem_capacity_bytes, tensorcores_per_chip)."""
    vmem_cap = 64 * 1024 * 1024          # conservative default (v7x per-TC VMEM)
    cores = 1
    try:
        info = pltpu.get_tpu_info()
        vmem_cap = int(getattr(info, "vmem_capacity_bytes", vmem_cap))
        for attr in ("num_cores", "tensorcores_per_chip", "core_count",
                     "num_tensorcores", "cores_per_chip"):
            v = getattr(info, attr, None)
            if v:
                cores = max(1, int(v))
                break
    except Exception:
        pass
    return vmem_cap, cores


def _vmem_plan():
    vmem_cap, cores = _tpu_hw()
    # Working-set budget for all double-buffered blocks + temporaries: ~70% of
    # physical VMEM, capped at 68 MiB (plenty to amortize the ~0.35 us/step
    # overhead on v5e/v6e while leaving headroom on v7x's 64 MiB).
    ws_budget = min(int(0.70 * vmem_cap), 68 * 1024 * 1024)
    # Explicit scoped-VMEM limit well above the working set (fixes v5e's 16 MiB
    # default-scoped-VMEM collision) but safely below physical capacity.
    vmem_limit = int(min(int(0.92 * vmem_cap), ws_budget + 28 * 1024 * 1024))
    return ws_budget, vmem_limit, cores


def _choose_tile_rows(B, D, isz_a, isz_b, ws_budget):
    # Per-row VMEM bytes:
    #   * both inputs, double-buffered by the BlockSpec pipeline: 2*(isz_a+isz_b)*D
    #   * headroom for ~4 full-width f32 elementwise temporaries: 16*D
    #   * per-row weight block (tb,1), conservatively assuming 128-lane padding,
    #     double-buffered: 2*512
    align = max(8, 32 // max(1, min(isz_a, isz_b)))   # 8 for f32, 16 for bf16
    per_row = 2 * D * (isz_a + isz_b) + 16 * D + 2 * 512
    tb = max(align, ws_budget // per_row)
    tb = min(tb, _round_up(B, align))                 # never bigger than the batch
    tb = max(align, (tb // align) * align)
    return int(tb)


def _make_wmse_kernel(B, tb, steps, nblocks):
    """Kernel closure over static sizes (no scalar prefetch needed)."""

    def kernel(xr_ref, x_ref, w_ref, out_ref, acc_ref):
        c = pl.program_id(0)          # split (TensorCore) axis
        i = pl.program_id(1)          # accumulating batch-tile axis

        @pl.when(i == 0)
        def _init():
            acc_ref[...] = jnp.zeros_like(acc_ref)

        # Logical (un-clamped) block index / global row range of this step.
        blk = c * steps + i
        row0 = blk * tb
        rows = row0 + jax.lax.broadcasted_iota(jnp.int32, (tb, 1), 0)
        valid = (rows < B) & (blk < nblocks)      # ragged last tile + duplicate blocks

        # Hot path: stream native dtype, upcast per tile, pure VPU elementwise.
        diff = xr_ref[...].astype(jnp.float32) - x_ref[...].astype(jnp.float32)
        # w already carries the 1/D factor.  Select AFTER the multiply so garbage
        # rows (OOB reads of the partial last block) never contribute NaN/Inf.
        contrib = jnp.where(valid, w_ref[...] * (diff * diff), 0.0)      # (tb, D)
        # Lane-wide accumulator: per-step reduction over the sublane axis lowers to
        # cross-vreg VPU adds; the single cross-lane reduce is done in the finalize.
        acc_ref[...] += jnp.sum(contrib, axis=0, keepdims=True)          # (1, D)

        @pl.when(i == steps - 1)
        def _finalize():
            # One lane-dense (1, 8, 128) write per split.
            out_ref[...] = jnp.broadcast_to(jnp.sum(acc_ref[...]), out_ref.shape)

    return kernel


@functools.partial(jax.jit, static_argnames=("tile_rows",))
def _wmse_pallas(x_recon, x, w_rows, tile_rows=None):
    """w_rows: (B, 1) f32 per-row weights, already scaled by 1/D."""
    B, D = x.shape
    ws_budget, vmem_limit, cores = _vmem_plan()
    isz_a = jnp.dtype(x_recon.dtype).itemsize
    isz_b = jnp.dtype(x.dtype).itemsize

    if tile_rows is not None:
        tb = max(8, (int(tile_rows) // 8) * 8)
    else:
        tb = _choose_tile_rows(B, D, isz_a, isz_b, ws_budget)

    nblocks = pl.cdiv(B, tb)
    num_splits = max(1, min(int(cores), nblocks))     # 1 on v5e/v6e, 2 on v7x
    steps = pl.cdiv(nblocks, num_splits)
    grid = (num_splits, steps)

    def blk_map(c, i):
        # Clamp so a (rare) trailing block on the last split never DMAs a block
        # whose start is past the array; its contribution is masked in-kernel.
        return (jnp.minimum(c * steps + i, nblocks - 1), 0)

    kernel = _make_wmse_kernel(B, tb, steps, nblocks)

    out = pl.pallas_call(
        kernel,
        out_shape=jax.ShapeDtypeStruct((num_splits, 8, 128), jnp.float32),
        grid_spec=pltpu.PrefetchScalarGridSpec(
            num_scalar_prefetch=0,
            grid=grid,
            in_specs=[
                pl.BlockSpec((tb, D), blk_map),   # x_recon tile (native dtype)
                pl.BlockSpec((tb, D), blk_map),   # x tile (native dtype)
                pl.BlockSpec((tb, 1), blk_map),   # per-row weights (already / D)
            ],
            out_specs=pl.BlockSpec((1, 8, 128), lambda c, i: (c, 0, 0)),
            scratch_shapes=[pltpu.VMEM((1, D), jnp.float32)],
        ),
        compiler_params=pltpu.CompilerParams(
            # If an xprof trace on v7x shows one idle TensorCore, switch the first
            # axis to pltpu.CORE_PARALLEL (grid axis length == core count already).
            dimension_semantics=("parallel", "arbitrary"),
            vmem_limit_bytes=vmem_limit,
        ),
        cost_estimate=pl.CostEstimate(
            flops=3 * B * D + 2 * B,
            transcendentals=0,
            bytes_accessed=B * D * (isz_a + isz_b) + 4 * B + num_splits * 8 * 128 * 4,
        ),
    )(x_recon, x, w_rows)

    # One partial sum per split; 1/D is folded into w_rows, so only 1/B remains.
    return jnp.sum(out[:, 0, 0]) * (1.0 / B)


def weighted_mse_loss(x_recon, x, labels, weight_dict=None, tile_rows=None):
    """JAX wrapper mirroring WeightedMSELoss.forward.

    x_recon, x : (B, D) float32 or bfloat16 (streamed in native dtype)
    labels     : (B,) int
    weight_dict: {label_int: weight_float} or None/empty
    """
    x_recon = jnp.asarray(x_recon)
    x = jnp.asarray(x)
    if x_recon.dtype != x.dtype:
        ct = jnp.promote_types(x_recon.dtype, x.dtype)
        x_recon, x = x_recon.astype(ct), x.astype(ct)
    B, D = x.shape

    if weight_dict:
        # Dense lookup table spanning [min_key, max_key] (handles negative keys),
        # defaulting to 1.0 outside the dict -- matches dict.get semantics.
        keys = [int(k) for k in weight_dict.keys()]
        lo, hi = min(keys), max(keys)
        table = [1.0] * (hi - lo + 1)
        for k, v in weight_dict.items():
            table[int(k) - lo] = float(v)
        table = jnp.asarray(table, jnp.float32)
        labels = jnp.asarray(labels, jnp.int32)
        idx = labels - lo
        in_range = (idx >= 0) & (idx <= hi - lo)
        weights = jnp.where(in_range, table[jnp.clip(idx, 0, hi - lo)], 1.0)
    else:
        weights = jnp.ones((B,), jnp.float32)

    # Fold the per-row 1/D mean into the (tiny) weight stream; 1/B stays scalar.
    w_rows = (weights.astype(jnp.float32) * (1.0 / D)).reshape(B, 1)
    return _wmse_pallas(x_recon, x, w_rows, tile_rows=tile_rows)


def _reference(x_recon, x, labels, weight_dict):
    xr = jnp.asarray(x_recon, jnp.float32)
    xx = jnp.asarray(x, jnp.float32)
    mse = jnp.mean((xr - xx) ** 2, axis=1)
    if weight_dict:
        w = jnp.asarray(
            [float(weight_dict.get(int(l), 1.0)) for l in labels], jnp.float32
        )
        return jnp.mean(w * mse)
    return jnp.mean(mse)


if __name__ == "__main__":
    key = jax.random.PRNGKey(0)
    k1, k2, k3 = jax.random.split(key, 3)

    # Case 1: small, weighted (negative dict key + labels missing from the dict).
    B, D = 8, 32
    x = jax.random.normal(k1, (B, D), jnp.float32)
    x_recon = x + 0.1 * jax.random.normal(k2, (B, D), jnp.float32)
    labels = jnp.array([-1, 0, 1, 2, 5, 1, 0, 2], jnp.int32)
    weight_dict = {-1: 3.0, 0: 1.0, 1: 2.5, 2: 0.5}
    loss_w = weighted_mse_loss(x_recon, x, labels, weight_dict)
    jax.block_until_ready(loss_w)
    ref_w = _reference(x_recon, x, list(jax.device_get(labels)), weight_dict)
    assert jnp.allclose(loss_w, ref_w, rtol=1e-5, atol=1e-6), (loss_w, ref_w)

    # Case 2: unweighted path (empty weight_dict).
    loss_u = weighted_mse_loss(x_recon, x, labels, None)
    jax.block_until_ready(loss_u)
    ref_u = _reference(x_recon, x, list(jax.device_get(labels)), None)
    assert jnp.allclose(loss_u, ref_u, rtol=1e-5, atol=1e-6), (loss_u, ref_u)

    # Case 3: ragged batch, several accumulation steps, masked partial last tile.
    B2, D2 = 50, 96
    kk1, kk2, kk3 = jax.random.split(jax.random.PRNGKey(1), 3)
    x2 = jax.random.normal(kk1, (B2, D2), jnp.float32)
    xr2 = x2 + 0.05 * jax.random.normal(kk2, (B2, D2), jnp.float32)
    lb2 = jax.random.randint(kk3, (B2,), 0, 4, jnp.int32)
    wd2 = {0: 2.0, 2: 0.25, 3: 1.5}
    loss2 = weighted_mse_loss(xr2, x2, lb2, wd2, tile_rows=8)
    jax.block_until_ready(loss2)
    ref2 = _reference(xr2, x2, list(jax.device_get(lb2)), wd2)
    assert jnp.allclose(loss2, ref2, rtol=1e-5, atol=1e-6), (loss2, ref2)

    # Case 4: bf16 inputs stream at half the HBM bytes; accumulation stays f32.
    B3, D3 = 64, 128
    kb1, kb2, kb3 = jax.random.split(jax.random.PRNGKey(2), 3)
    x3 = jax.random.normal(kb1, (B3, D3), jnp.float32)
    xr3 = x3 + 0.1 * jax.random.normal(kb2, (B3, D3), jnp.float32)
    x3b, xr3b = x3.astype(jnp.bfloat16), xr3.astype(jnp.bfloat16)
    lb3 = jax.random.randint(kb3, (B3,), 0, 3, jnp.int32)
    wd3 = {0: 1.0, 1: 4.0, 2: 0.5}
    loss3 = weighted_mse_loss(xr3b, x3b, lb3, wd3)
    jax.block_until_ready(loss3)
    ref3 = _reference(xr3b, x3b, list(jax.device_get(lb3)), wd3)
    assert jnp.allclose(loss3, ref3, rtol=1e-3, atol=1e-5), (loss3, ref3)

    print("KERNEL_OK")
</pallas_src>

<mosaic_0001>
module attributes {stable_mosaic.version = 11 : i64} {
  func.func @kernel(%arg0: i32, %arg1: i32, %arg2: memref<8x32xf32, #tpu.memory_space<vmem>>, %arg3: memref<8x32xf32, #tpu.memory_space<vmem>>, %arg4: memref<8x1xf32, #tpu.memory_space<vmem>>, %arg5: memref<1x8x128xf32, #tpu.memory_space<vmem>>, %arg6: memref<1x32xf32, #tpu.memory_space<vmem>>) attributes {dimension_semantics = [#tpu.dimension_semantics<parallel>, #tpu.dimension_semantics<arbitrary>], iteration_bounds = array<i64: 1, 1>, scalar_prefetch = 0 : i64, scratch_operands = 1 : i64, tpu.core_type = #tpu.core_type<tc>, window_params = [{transform_indices = @transform_0, window_bounds = array<i64: 8, 32>}, {transform_indices = @transform_1, window_bounds = array<i64: 8, 32>}, {transform_indices = @transform_2, window_bounds = array<i64: 8, 1>}, {transform_indices = @transform_3, window_bounds = array<i64: 1, 8, 128>}]} {
    %c0_i32 = arith.constant 0 : i32
    %0 = arith.cmpi eq, %arg1, %c0_i32 : i32
    %1 = arith.extui %0 : i1 to i32
    %c0_i32_0 = arith.constant 0 : i32
    %2 = arith.cmpi ne, %1, %c0_i32_0 : i32
    scf.if %2 {
      %cst_15 = arith.constant 0.000000e+00 : f32
      %33 = vector.broadcast %cst_15 : f32 to vector<1x32xf32>
      %c0_16 = arith.constant 0 : index
      %c0_17 = arith.constant 0 : index
      %34 = vector.load %arg6[%c0_16, %c0_17] : memref<1x32xf32, #tpu.memory_space<vmem>>, vector<1x32xf32>
      tpu.vector_store %arg6[%c0_16, %c0_17], %33 {strides = array<i32>} : memref<1x32xf32, #tpu.memory_space<vmem>>, vector<1x32xf32>,
    } else {
    }
    %c1_i32 = arith.constant 1 : i32
    %3 = arith.muli %arg0, %c1_i32 : i32
    %4 = arith.addi %3, %arg1 : i32
    %c8_i32 = arith.constant 8 : i32
    %5 = arith.muli %4, %c8_i32 : i32
    %6 = tpu.iota {dimensions = array<i32: 0>} : vector<8x1xi32>
    %7 = vector.broadcast %5 : i32 to vector<8x1xi32>
    %8 = arith.addi %7, %6 : vector<8x1xi32>
    %c8_i32_1 = arith.constant 8 : i32
    %9 = vector.broadcast %c8_i32_1 : i32 to vector<8x1xi32>
    %10 = arith.cmpi slt, %8, %9 : vector<8x1xi32>
    %c1_i32_2 = arith.constant 1 : i32
    %11 = arith.cmpi slt, %4, %c1_i32_2 : i32
    %12 = vector.broadcast %11 : i1 to vector<8x1xi1>
    %13 = arith.andi %10, %12 : vector<8x1xi1>
    %c0 = arith.constant 0 : index
    %c0_3 = arith.constant 0 : index
    %14 = vector.load %arg2[%c0, %c0_3] : memref<8x32xf32, #tpu.memory_space<vmem>>, vector<8x32xf32>
    %c0_4 = arith.constant 0 : index
    %c0_5 = arith.constant 0 : index
    %15 = vector.load %arg3[%c0_4, %c0_5] : memref<8x32xf32, #tpu.memory_space<vmem>>, vector<8x32xf32>
    %16 = arith.subf %14, %15 : vector<8x32xf32>
    %c0_6 = arith.constant 0 : index
    %c0_7 = arith.constant 0 : index
    %17 = vector.load %arg4[%c0_6, %c0_7] : memref<8x1xf32, #tpu.memory_space<vmem>>, vector<8x1xf32>
    %18 = arith.mulf %16, %16 : vector<8x32xf32>
    %19 = vector.broadcast %17 : vector<8x1xf32> to vector<8x32xf32>
    %20 = arith.mulf %19, %18 : vector<8x32xf32>
    %cst = arith.constant 0.000000e+00 : f32
    %21 = vector.shape_cast %13 : vector<8x1xi1> to vector<8x1xi1>
    %22 = vector.broadcast %21 : vector<8x1xi1> to vector<8x32xi1>
    %23 = vector.broadcast %cst : f32 to vector<8x32xf32>
    %24 = arith.select %22, %20, %23 : vector<8x32xi1>, vector<8x32xf32>
    %c0_8 = arith.constant 0 : index
    %c0_9 = arith.constant 0 : index
    %25 = vector.load %arg6[%c0_8, %c0_9] : memref<1x32xf32, #tpu.memory_space<vmem>>, vector<1x32xf32>
    %cst_10 = arith.constant dense<0.000000e+00> : vector<32xf32>
    %26 = vector.multi_reduction <add>, %24, %cst_10 [0] : vector<8x32xf32> to vector<32xf32>
    %27 = vector.shape_cast %26 : vector<32xf32> to vector<1x32xf32>
    %28 = arith.addf %25, %27 : vector<1x32xf32>
    %c0_11 = arith.constant 0 : index
    %c0_12 = arith.constant 0 : index
    %29 = vector.load %arg6[%c0_11, %c0_12] : memref<1x32xf32, #tpu.memory_space<vmem>>, vector<1x32xf32>
    tpu.vector_store %arg6[%c0_11, %c0_12], %28 {strides = array<i32>} : memref<1x32xf32, #tpu.memory_space<vmem>>, vector<1x32xf32>,
    %c0_i32_13 = arith.constant 0 : i32
    %30 = arith.cmpi eq, %arg1, %c0_i32_13 : i32
    %31 = arith.extui %30 : i1 to i32
    %c0_i32_14 = arith.constant 0 : i32
    %32 = arith.cmpi ne, %31, %c0_i32_14 : i32
    scf.if %32 {
      %c0_15 = arith.constant 0 : index
      %c0_16 = arith.constant 0 : index
      %33 = vector.load %arg6[%c0_15, %c0_16] : memref<1x32xf32, #tpu.memory_space<vmem>>, vector<1x32xf32>
      %34 = vector.shape_cast %33 : vector<1x32xf32> to vector<1x1x32xf32>
      %cst_17 = arith.constant dense<0.000000e+00> : vector<1xf32>
      %35 = vector.multi_reduction <add>, %34, %cst_17 [1, 2] : vector<1x1x32xf32> to vector<1xf32>
      %36 = vector.shape_cast %35 : vector<1xf32> to vector<1x1x1xf32>
      %37 = vector.extract %36[0, 0, 0] : f32 from vector<1x1x1xf32>
      %38 = vector.broadcast %37 : f32 to vector<1x8x128xf32>
      %c0_18 = arith.constant 0 : index
      %c0_19 = arith.constant 0 : index
      %c0_20 = arith.constant 0 : index
      %39 = vector.load %arg5[%c0_18, %c0_19, %c0_20] : memref<1x8x128xf32, #tpu.memory_space<vmem>>, vector<1x8x128xf32>
      tpu.vector_store %arg5[%c0_18, %c0_19, %c0_20], %38 {strides = array<i32>} : memref<1x8x128xf32, #tpu.memory_space<vmem>>, vector<1x8x128xf32>,
    } else {
    }
    return
  }
  func.func @transform_0(%arg0: i32, %arg1: i32) -> (i32, i32) {
    %c1_i32 = arith.constant 1 : i32
    %0 = arith.muli %arg0, %c1_i32 : i32
    %1 = arith.addi %0, %arg1 : i32
    %c0_i32 = arith.constant 0 : i32
    %2 = arith.minsi %1, %c0_i32 : i32
    %c0_i32_0 = arith.constant 0 : i32
    %c0_i32_1 = arith.constant 0 : i32
    return %2, %c0_i32_0 : i32, i32
  }
  func.func @transform_1(%arg0: i32, %arg1: i32) -> (i32, i32) {
    %c1_i32 = arith.constant 1 : i32
    %0 = arith.muli %arg0, %c1_i32 : i32
    %1 = arith.addi %0, %arg1 : i32
    %c0_i32 = arith.constant 0 : i32
    %2 = arith.minsi %1, %c0_i32 : i32
    %c0_i32_0 = arith.constant 0 : i32
    %c0_i32_1 = arith.constant 0 : i32
    return %2, %c0_i32_0 : i32, i32
  }
  func.func @transform_2(%arg0: i32, %arg1: i32) -> (i32, i32) {
    %c1_i32 = arith.constant 1 : i32
    %0 = arith.muli %arg0, %c1_i32 : i32
    %1 = arith.addi %0, %arg1 : i32
    %c0_i32 = arith.constant 0 : i32
    %2 = arith.minsi %1, %c0_i32 : i32
    %c0_i32_0 = arith.constant 0 : i32
    %c0_i32_1 = arith.constant 0 : i32
    return %2, %c0_i32_0 : i32, i32
  }
  func.func @transform_3(%arg0: i32, %arg1: i32) -> (i32, i32, i32) {
    %c0_i32 = arith.constant 0 : i32
    %c0_i32_0 = arith.constant 0 : i32
    %c0_i32_1 = arith.constant 0 : i32
    return %arg0, %c0_i32, %c0_i32_0 : i32, i32, i32
  }
}

</mosaic_0001>

<bundles_post_ra>
// kernel: _wmse_pallas.1
= control target key start
LH: loop header
LB: loop body
LE: loop exit
PB: predicated region body
PF: predicated region fallthrough
CT: control target
= control target key end

     0   :  { %8 = vsyncpa [#allocation4], 0  ;;  %s195_s12 = smov [#allocation3]   ;;  %s233_s0 = inlined_call_operand.vmem [shape: f32[8,32], index: 0, kind: input, shape index: {}]   ;;  %s234_s1 = inlined_call_operand.hbm [shape: f32[8,32], index: 1, kind: input, shape index: {}]   ;;  %s235_s2 = inlined_call_operand.vmem [shape: f32[8,1], index: 2, kind: input, shape index: {}]   ;;  %s236_s3 = inlined_call_operand.vmem [shape: f32[1,8,128], index: 3, kind: output, shape index: {}]  }
   0x1   :  { %s32_s13 = sshll.u32 %s195_s12, 4  ;;  %s33_s13 = int_to_ptr.vmem [resolvable:$true] %s32_s13 }
   0x2   :  { %s181_s14 = scalar_lea.vmem %s33_s13, 128  ;;  %p186_p1 = scmp.lt.s32.totalorder %s33_s13, %s33_s13 }
   0x3   :  { %p182_p0 = scmp.ne.s32.totalorder %s33_s13, %s181_s14  ;;  %p187_p2 = scmp.lt.s32.totalorder %s181_s14, %s181_s14 }
   0x5   :  { %p188_p3 = por %p187_p2, %p186_p1 }
   0x7   :  { %p189_p4 = pnand %p188_p3, %p182_p0 }
   0x9   :  { %192 = shalt.err (!%p189_p4)
}
   0xa   :  { %35 = dma.hbm_to_vmem [thread:$0]  %s234_s1, 128, %s33_s13, [#allocation4]  }
   0xb   :  { %193 = dma.done.wait [#allocation4], 128  }
   0xc   :  { %194 = vsyncadd [#allocation4], 4294967168  ;;  %v196_v0 = vmov 0   ;;  %v109_v1 = vld [vmem:[%s235_s2] sm:$0xff]  ;;  %vm92_vm0 = vcmask 253952   ;;  %v197_v2 = vmov 0.0  }
   0xd   :  { %172 = vset.pattern.permute.xlu0 %v196_v0  ;;  %93 = vst.msk [vmem:[#allocation2] sm:$0x1] %vm92_vm0, %v197_v2  ;;  %v106_v3 = vld [vmem:[%s233_s0] sm:$0xff]  ;;  %vm121_vm1 = vcmask 261120  }
   0xe   :  { %113 = vperm.xlu0 %172, %v109_v1   ;;  %v107_v4 = vld [vmem:[#allocation3] sm:$0xff] }
   0xf   :  { %v108_v5 = vsub.f32 %v106_v3, %v107_v4 }
  0x11   :  { %v110_v6 = vmul.f32 %v108_v5, %v108_v5 }
  0x14   :  { %v120_v15 = vld [vmem:[#allocation2] sm:$0x1] }
  0x89   :  { %v114_v7 = vpop.permute.xlu0 %113 }
  0x8a   :  { %v116_v8 = vmul.f32 %v114_v7, %v110_v6 }
  0x8c   :  { %v122_v9 = vsel %vm121_vm1, %v116_v8, 0.0 }
  0x8d   :  { %v123_v10 = vrot.slane %v122_v9, 4 }
  0x8f   :  { %v124_v11 = vadd.f32 %v123_v10, %v122_v9 }
  0x91   :  { %v125_v12 = vrot.slane %v124_v11, 2 }
  0x93   :  { %v126_v13 = vadd.f32 %v125_v12, %v124_v11 }
  0x95   :  { %v127_v14 = vrot.slane %v126_v13, 1 }
  0x97   :  { %v128_v16 = vadd.f32 %v127_v14, %v126_v13 }
  0x99   :  { %v129_v17 = vadd.f32 %v128_v16, %v120_v15 }
  0x9b   :  { %131 = vst.msk [vmem:[#allocation2] sm:$0x1] %vm92_vm0, %v129_v17 }
  0xa2   :  { %v135_v18 = vld [vmem:[#allocation2] sm:$0x1] }
  0xa3   :  { %v136_v19 = vsel %vm92_vm0, %v135_v18, 0.0 }
  0xa4   :  { %137 = vadd.xlane.f32.xlu0 %v136_v19 }
 0x12d   :  { %v138_v20 = vpop.xlane.xlu0 %137 }
 0x12e   :  { %v139_v21 = vrot.slane %v138_v20, 4 }
 0x130   :  { %v140_v22 = vadd.f32 %v139_v21, %v138_v20 }
 0x132   :  { %v141_v23 = vrot.slane %v140_v22, 2 }
 0x134   :  { %v142_v24 = vadd.f32 %v141_v23, %v140_v22 }
 0x136   :  { %v143_v25 = vrot.slane %v142_v24, 1 }
 0x138   :  { %v144_v26 = vadd.f32 %v143_v25, %v142_v24 }
 0x13a   :  { %167 = vpush %v144_v26 }
 0x16b   :  { %s168_s0 = spop %167 }
 0x16c   :  { %v146_v27 = vstv %s168_s0 }
 0x16d   :  { %147 = vst [vmem:[%s236_s3] sm:$0xff] %v146_v27 }
 0x16e   :  { %152 = vsyncpa [#allocation4], 1 }

</bundles_post_ra>
